<compile_context>
chip_gen: v7x
topology: tpu7x:2x2x1
jax: 0.10.0
libtpu: 0.0.40
codegen_flags: <defaults>
</compile_context>

<pallas_src>
import jax
import jax.numpy as jnp
from jax import lax
from jax.experimental import pallas as pl
from jax.experimental.pallas import tpu as pltpu

_LN_EPS = 1e-12


def _round_up(x, m):
    return ((x + m - 1) // m) * m


def _region_cls_kernel(x_ref, w1_ref, b1_ref, g_ref, beta_ref, w2_ref, b2_ref, o_ref):
    # x tile: (TM, H) bf16.  Linear(H, H): f32 accumulate on the MXU.
    h = jnp.dot(x_ref[...], w1_ref[...], preferred_element_type=jnp.float32)
    h = h + b1_ref[...]

    # ReLU
    h = jnp.maximum(h, 0.0)

    # BertLayerNorm(H, eps=1e-12): biased variance over last dim, f32 math.
    # gamma fused into the rsqrt scale (one fewer standalone full-tile multiply).
    mean = jnp.mean(h, axis=-1, keepdims=True)
    centered = h - mean
    var = jnp.mean(centered * centered, axis=-1, keepdims=True)
    scale = g_ref[...] * lax.rsqrt(var + _LN_EPS)
    h = centered * scale + beta_ref[...]

    # Linear(H, Lp): bf16 operands, f32 accumulate, lane-dense (padded) N.
    out = jnp.dot(h.astype(jnp.bfloat16), w2_ref[...],
                  preferred_element_type=jnp.float32)
    o_ref[...] = (out + b2_ref[...]).astype(o_ref.dtype)


def region_classification(x, params, *, block_rows=256):
    """x: (..., H) float32.  params: dict of w1,b1,gamma,beta,w2,b2 (JAX (in,out) layout)."""
    w1, b1, gamma, beta, w2, b2 = (
        params["w1"], params["b1"], params["gamma"],
        params["beta"], params["w2"], params["b2"],
    )
    H = w1.shape[0]
    L = w2.shape[1]

    orig_shape = x.shape
    x2 = x.reshape(-1, H)
    R = x2.shape[0]

    # --- Row tiling: TM multiple of 8, pad rows so the grid divides evenly. ---
    TM = min(block_rows, _round_up(R, 8))
    Rp = _round_up(R, TM)
    num_tiles = Rp // TM

    # --- Lane-dense label dimension: pad L up to a multiple of 128. ---
    Lp = _round_up(L, 128)

    # bf16 streaming operand / resident weights (halves HBM traffic, MXU-native).
    x_bf16 = x2.astype(jnp.bfloat16)
    if Rp != R:
        x_bf16 = jnp.pad(x_bf16, ((0, Rp - R), (0, 0)))
    w1_bf16 = w1.astype(jnp.bfloat16)
    w2_bf16 = jnp.pad(w2, ((0, 0), (0, Lp - L))).astype(jnp.bfloat16)
    b2_pad = jnp.pad(b2, ((0, 0), (0, Lp - L))).astype(jnp.float32)
    b1_f32 = b1.astype(jnp.float32)
    gamma_f32 = gamma.astype(jnp.float32)
    beta_f32 = beta.astype(jnp.float32)

    out_dtype = jnp.float32

    # Advisory cost estimate for the XLA scheduler.
    cost = pl.CostEstimate(
        flops=2 * Rp * H * H + 2 * Rp * H * Lp,
        transcendentals=Rp,  # one rsqrt per row
        bytes_accessed=(Rp * H * 2            # x (bf16)
                        + H * H * 2           # W1 (bf16)
                        + H * Lp * 2          # W2 (bf16)
                        + (3 * H + Lp) * 4    # b1, gamma, beta, b2
                        + Rp * Lp * 4),       # out (f32)
    )

    # VMEM budget: resident weights + double-buffered x/out tiles + f32 scratch.
    vmem_bytes = (
        H * H * 2 + H * Lp * 2          # resident weights (bf16)
        + 2 * TM * H * 2                # double-buffered x tiles (bf16)
        + 2 * TM * Lp * 4               # double-buffered out tiles (f32)
        + 4 * TM * H * 4                # f32 intermediates headroom
        + 4 * (3 * H + Lp) * 4          # biases / LN params
    )
    vmem_limit = min(max(2 * vmem_bytes, 16 * 1024 * 1024), 96 * 1024 * 1024)

    out = pl.pallas_call(
        _region_cls_kernel,
        out_shape=jax.ShapeDtypeStruct((Rp, Lp), out_dtype),
        grid_spec=pltpu.PrefetchScalarGridSpec(
            num_scalar_prefetch=0,
            grid=(num_tiles,),
            in_specs=[
                pl.BlockSpec((TM, H), lambda i: (i, 0)),   # x tile (streamed)
                pl.BlockSpec((H, H), lambda i: (0, 0)),    # W1 (resident)
                pl.BlockSpec((1, H), lambda i: (0, 0)),    # b1
                pl.BlockSpec((1, H), lambda i: (0, 0)),    # gamma
                pl.BlockSpec((1, H), lambda i: (0, 0)),    # beta
                pl.BlockSpec((H, Lp), lambda i: (0, 0)),   # W2 padded (resident)
                pl.BlockSpec((1, Lp), lambda i: (0, 0)),   # b2 padded
            ],
            out_specs=pl.BlockSpec((TM, Lp), lambda i: (i, 0)),
        ),
        compiler_params=pltpu.CompilerParams(
            dimension_semantics=("parallel",),
            vmem_limit_bytes=vmem_limit,
        ),
        cost_estimate=cost,
    )(x_bf16, w1_bf16, b1_f32, gamma_f32, beta_f32, w2_bf16, b2_pad)

    # Slice off row padding and label-dim padding.
    out = out[:R, :L]
    return out.reshape(*orig_shape[:-1], L)


def init_params(key, hidden_size, label_dim):
    """Deterministic synthetic parameters (PyTorch Linear stores (out,in); we
    keep the transposed (in,out) layout the kernel consumes)."""
    k1, k2, k3, k4 = jax.random.split(key, 4)
    s1 = 1.0 / jnp.sqrt(hidden_size)
    w1_t = jax.random.uniform(k1, (hidden_size, hidden_size), jnp.float32, -s1, s1)  # (out,in)
    b1 = jax.random.uniform(k2, (1, hidden_size), jnp.float32, -s1, s1)
    w2_t = jax.random.uniform(k3, (label_dim, hidden_size), jnp.float32, -s1, s1)    # (out,in)
    b2 = jax.random.uniform(k4, (1, label_dim), jnp.float32, -s1, s1)
    return {
        "w1": w1_t.T,                                        # (in, out)
        "b1": b1,
        "gamma": jnp.ones((1, hidden_size), jnp.float32),    # BertLayerNorm weight init = 1
        "beta": jnp.zeros((1, hidden_size), jnp.float32),    # BertLayerNorm bias init = 0
        "w2": w2_t.T,                                        # (in, out)
        "b2": b2,
    }


def _reference(x, p):
    """Pure-JAX f32 reference of the PyTorch forward for sanity checking."""
    h = x @ p["w1"] + p["b1"]
    h = jnp.maximum(h, 0.0)
    mean = jnp.mean(h, axis=-1, keepdims=True)
    var = jnp.mean((h - mean) ** 2, axis=-1, keepdims=True)
    h = (h - mean) / jnp.sqrt(var + _LN_EPS)
    h = h * p["gamma"] + p["beta"]
    return h @ p["w2"] + p["b2"]


if __name__ == "__main__":
    batch, seq, hidden, label_dim = 2, 8, 32, 16

    key = jax.random.PRNGKey(0)
    k_x, k_p = jax.random.split(key)
    x = jax.random.normal(k_x, (batch, seq, hidden), jnp.float32)
    params = init_params(k_p, hidden, label_dim)

    out = region_classification(x, params)
    out = jax.block_until_ready(out)

    ref = _reference(x.reshape(-1, hidden), params).reshape(batch, seq, label_dim)
    assert out.shape == (batch, seq, label_dim)
    # bf16 MXU operands with f32 accumulation -> slightly looser tolerance.
    assert jnp.allclose(out, ref, atol=3e-2, rtol=3e-2), \
        float(jnp.max(jnp.abs(out - ref)))

    print("KERNEL_OK")
</pallas_src>

<mosaic_0001>
module attributes {stable_mosaic.version = 11 : i64} {
  func.func @_region_cls_kernel(%arg0: i32, %arg1: memref<16x32xbf16, #tpu.memory_space<vmem>>, %arg2: memref<32x32xbf16, #tpu.memory_space<vmem>>, %arg3: memref<1x32xf32, #tpu.memory_space<vmem>>, %arg4: memref<1x32xf32, #tpu.memory_space<vmem>>, %arg5: memref<1x32xf32, #tpu.memory_space<vmem>>, %arg6: memref<32x128xbf16, #tpu.memory_space<vmem>>, %arg7: memref<1x128xf32, #tpu.memory_space<vmem>>, %arg8: memref<16x128xf32, #tpu.memory_space<vmem>>) attributes {dimension_semantics = [#tpu.dimension_semantics<parallel>], iteration_bounds = array<i64: 1>, scalar_prefetch = 0 : i64, scratch_operands = 0 : i64, tpu.core_type = #tpu.core_type<tc>, window_params = [{transform_indices = @transform_0, window_bounds = array<i64: 16, 32>}, {pipeline_mode = #tpu.pipeline_mode<synchronous>, transform_indices = @transform_1, window_bounds = array<i64: 32, 32>}, {pipeline_mode = #tpu.pipeline_mode<synchronous>, transform_indices = @transform_2, window_bounds = array<i64: 1, 32>}, {pipeline_mode = #tpu.pipeline_mode<synchronous>, transform_indices = @transform_3, window_bounds = array<i64: 1, 32>}, {pipeline_mode = #tpu.pipeline_mode<synchronous>, transform_indices = @transform_4, window_bounds = array<i64: 1, 32>}, {pipeline_mode = #tpu.pipeline_mode<synchronous>, transform_indices = @transform_5, window_bounds = array<i64: 32, 128>}, {pipeline_mode = #tpu.pipeline_mode<synchronous>, transform_indices = @transform_6, window_bounds = array<i64: 1, 128>}, {transform_indices = @transform_7, window_bounds = array<i64: 16, 128>}]} {
    %c0 = arith.constant 0 : index
    %c0_0 = arith.constant 0 : index
    %0 = vector.load %arg1[%c0, %c0_0] : memref<16x32xbf16, #tpu.memory_space<vmem>>, vector<16x32xbf16>
    %c0_1 = arith.constant 0 : index
    %c0_2 = arith.constant 0 : index
    %1 = vector.load %arg2[%c0_1, %c0_2] : memref<32x32xbf16, #tpu.memory_space<vmem>>, vector<32x32xbf16>
    %cst = arith.constant dense<0.000000e+00> : vector<16x32xf32>
    %2 = tpu.matmul %0, %1, %cst {dimension_numbers = #tpu.dot_dimension_numbers<[1], [0], [0], [1], [0, 0, 1, 1], [], []>} : vector<16x32xbf16>, vector<32x32xbf16>, vector<16x32xf32> -> vector<16x32xf32>
    %c0_3 = arith.constant 0 : index
    %c0_4 = arith.constant 0 : index
    %3 = vector.load %arg3[%c0_3, %c0_4] : memref<1x32xf32, #tpu.memory_space<vmem>>, vector<1x32xf32>
    %4 = vector.broadcast %3 : vector<1x32xf32> to vector<16x32xf32>
    %5 = arith.addf %2, %4 : vector<16x32xf32>
    %cst_5 = arith.constant 0.000000e+00 : f32
    %6 = vector.broadcast %cst_5 : f32 to vector<16x32xf32>
    %7 = arith.maximumf %5, %6 : vector<16x32xf32>
    %cst_6 = arith.constant dense<0.000000e+00> : vector<16xf32>
    %8 = vector.multi_reduction <add>, %7, %cst_6 [1] : vector<16x32xf32> to vector<16xf32>
    %9 = vector.shape_cast %8 : vector<16xf32> to vector<16x1xf32>
    %cst_7 = arith.constant 3.200000e+01 : f32
    %10 = vector.broadcast %cst_7 : f32 to vector<16x1xf32>
    %11 = arith.divf %9, %10 : vector<16x1xf32>
    %12 = vector.broadcast %11 : vector<16x1xf32> to vector<16x32xf32>
    %13 = arith.subf %7, %12 : vector<16x32xf32>
    %14 = arith.mulf %13, %13 : vector<16x32xf32>
    %cst_8 = arith.constant dense<0.000000e+00> : vector<16xf32>
    %15 = vector.multi_reduction <add>, %14, %cst_8 [1] : vector<16x32xf32> to vector<16xf32>
    %16 = vector.shape_cast %15 : vector<16xf32> to vector<16x1xf32>
    %cst_9 = arith.constant 3.200000e+01 : f32
    %17 = vector.broadcast %cst_9 : f32 to vector<16x1xf32>
    %18 = arith.divf %16, %17 : vector<16x1xf32>
    %c0_10 = arith.constant 0 : index
    %c0_11 = arith.constant 0 : index
    %19 = vector.load %arg4[%c0_10, %c0_11] : memref<1x32xf32, #tpu.memory_space<vmem>>, vector<1x32xf32>
    %cst_12 = arith.constant 9.99999996E-13 : f32
    %20 = vector.broadcast %cst_12 : f32 to vector<16x1xf32>
    %21 = arith.addf %18, %20 : vector<16x1xf32>
    %22 = math.rsqrt %21 : vector<16x1xf32>
    %23 = vector.broadcast %19 : vector<1x32xf32> to vector<16x32xf32>
    %24 = vector.broadcast %22 : vector<16x1xf32> to vector<16x32xf32>
    %25 = arith.mulf %23, %24 : vector<16x32xf32>
    %26 = arith.mulf %13, %25 : vector<16x32xf32>
    %c0_13 = arith.constant 0 : index
    %c0_14 = arith.constant 0 : index
    %27 = vector.load %arg5[%c0_13, %c0_14] : memref<1x32xf32, #tpu.memory_space<vmem>>, vector<1x32xf32>
    %28 = vector.broadcast %27 : vector<1x32xf32> to vector<16x32xf32>
    %29 = arith.addf %26, %28 : vector<16x32xf32>
    %30 = arith.truncf %29 : vector<16x32xf32> to vector<16x32xbf16>
    %c0_15 = arith.constant 0 : index
    %c0_16 = arith.constant 0 : index
    %31 = vector.load %arg6[%c0_15, %c0_16] : memref<32x128xbf16, #tpu.memory_space<vmem>>, vector<32x128xbf16>
    %cst_17 = arith.constant dense<0.000000e+00> : vector<16x128xf32>
    %32 = tpu.matmul %30, %31, %cst_17 {dimension_numbers = #tpu.dot_dimension_numbers<[1], [0], [0], [1], [0, 0, 1, 1], [], []>} : vector<16x32xbf16>, vector<32x128xbf16>, vector<16x128xf32> -> vector<16x128xf32>
    %c0_18 = arith.constant 0 : index
    %c0_19 = arith.constant 0 : index
    %33 = vector.load %arg7[%c0_18, %c0_19] : memref<1x128xf32, #tpu.memory_space<vmem>>, vector<1x128xf32>
    %34 = vector.broadcast %33 : vector<1x128xf32> to vector<16x128xf32>
    %35 = arith.addf %32, %34 : vector<16x128xf32>
    %c0_20 = arith.constant 0 : index
    %c0_21 = arith.constant 0 : index
    %36 = vector.load %arg8[%c0_20, %c0_21] : memref<16x128xf32, #tpu.memory_space<vmem>>, vector<16x128xf32>
    tpu.vector_store %arg8[%c0_20, %c0_21], %35 {strides = array<i32>} : memref<16x128xf32, #tpu.memory_space<vmem>>, vector<16x128xf32>,
    return
  }
  func.func @transform_0(%arg0: i32) -> (i32, i32) {
    %c0_i32 = arith.constant 0 : i32
    %c0_i32_0 = arith.constant 0 : i32
    return %arg0, %c0_i32 : i32, i32
  }
  func.func @transform_1(%arg0: i32) -> (i32, i32) {
    %c0_i32 = arith.constant 0 : i32
    %c0_i32_0 = arith.constant 0 : i32
    %c0_i32_1 = arith.constant 0 : i32
    return %c0_i32, %c0_i32_0 : i32, i32
  }
  func.func @transform_2(%arg0: i32) -> (i32, i32) {
    %c0_i32 = arith.constant 0 : i32
    %c0_i32_0 = arith.constant 0 : i32
    %c0_i32_1 = arith.constant 0 : i32
    return %c0_i32, %c0_i32_0 : i32, i32
  }
  func.func @transform_3(%arg0: i32) -> (i32, i32) {
    %c0_i32 = arith.constant 0 : i32
    %c0_i32_0 = arith.constant 0 : i32
    %c0_i32_1 = arith.constant 0 : i32
    return %c0_i32, %c0_i32_0 : i32, i32
  }
  func.func @transform_4(%arg0: i32) -> (i32, i32) {
    %c0_i32 = arith.constant 0 : i32
    %c0_i32_0 = arith.constant 0 : i32
    %c0_i32_1 = arith.constant 0 : i32
    return %c0_i32, %c0_i32_0 : i32, i32
  }
  func.func @transform_5(%arg0: i32) -> (i32, i32) {
    %c0_i32 = arith.constant 0 : i32
    %c0_i32_0 = arith.constant 0 : i32
    %c0_i32_1 = arith.constant 0 : i32
    return %c0_i32, %c0_i32_0 : i32, i32
  }
  func.func @transform_6(%arg0: i32) -> (i32, i32) {
    %c0_i32 = arith.constant 0 : i32
    %c0_i32_0 = arith.constant 0 : i32
    %c0_i32_1 = arith.constant 0 : i32
    return %c0_i32, %c0_i32_0 : i32, i32
  }
  func.func @transform_7(%arg0: i32) -> (i32, i32) {
    %c0_i32 = arith.constant 0 : i32
    %c0_i32_0 = arith.constant 0 : i32
    return %arg0, %c0_i32 : i32, i32
  }
}

</mosaic_0001>

<bundles_post_ra>
// kernel: tpu_custom_call.1
= control target key start
LH: loop header
LB: loop body
LE: loop exit
PB: predicated region body
PF: predicated region fallthrough
CT: control target
= control target key end

     0   :  { %12 = vsyncpa [#allocation3], 0  ;;  %s549_s0 = inlined_call_operand.hbm [shape: bf16[16,32], index: 0, kind: input, shape index: {}]   ;;  %s550_s1 = inlined_call_operand.hbm [shape: bf16[32,32], index: 1, kind: input, shape index: {}]   ;;  %s551_s2 = inlined_call_operand.vmem [shape: f32[1,32], index: 2, kind: input, shape index: {}]   ;;  %s552_s3 = inlined_call_operand.vmem [shape: f32[1,32], index: 3, kind: input, shape index: {}]   ;;  %s553_s4 = inlined_call_operand.hbm [shape: f32[1,32], index: 4, kind: input, shape index: {}]   ;;  %s554_s5 = inlined_call_operand.vmem [shape: bf16[32,128], index: 5, kind: input, shape index: {}]   ;;  %s555_s6 = inlined_call_operand.vmem [shape: f32[1,128], index: 6, kind: input, shape index: {}]   ;;  %s556_s7 = inlined_call_operand.hbm [shape: f32[16,128], index: 7, kind: output, shape index: {}]  }
   0x1   :  { %13 = vsyncpa [#allocation6], 0 }
   0x2   :  { %14 = vsyncpa [#allocation4], 0  ;;  %s423_s24 = smov [#allocation5]   ;;  %s424_s26 = smov [#allocation2]  }
   0x3   :  { %s32_s25 = sshll.u32 %s423_s24, 4  ;;  %s20_s27 = sshll.u32 %s424_s26, 4  ;;  %s33_s25 = int_to_ptr.vmem [resolvable:$true] %s32_s25  ;;  %s473_s27 = int_to_ptr.vmem [resolvable:$true] %s20_s27 }
   0x4   :  { %s329_s30 = scalar_lea.hbm %s550_s1, 256 }
   0x5   :  { %p330_p0 = scmp.ne.s32.totalorder %s550_s1, %s329_s30  ;;  %p333_p1 = scmp.lt.u32.totalorder %s329_s30, %s550_s1 }
   0x7   :  { %p335_p2 = pnand %p333_p1, %p330_p0 }
   0x9   :  { %338 = shalt.err (!%p335_p2)
}
   0xa   :  { %s339_s12 = scalar_lea.vmem %s33_s25, 256  ;;  %p344_p4 = scmp.lt.s32.totalorder %s33_s25, %s33_s25 }
   0xb   :  { %p340_p3 = scmp.ne.s32.totalorder %s33_s25, %s339_s12  ;;  %p345_p5 = scmp.lt.s32.totalorder %s339_s12, %s339_s12 }
   0xd   :  { %p346_p6 = por %p345_p5, %p344_p4 }
   0xf   :  { %p347_p7 = pnand %p346_p6, %p340_p3 }
  0x11   :  { %350 = shalt.err (!%p347_p7)
}
  0x12   :  { %s425_s13 = smov 64   ;;  %s426_s14 = smov 4  }
  0x13   :  { %38 = dma.hbm_to_vmem [thread:$0]  %s550_s1, 256, %s33_s25, [#allocation6], %s425_s13, %s425_s13, %s426_s14  }
  0x14   :  { %s351_s19 = scalar_lea.hbm %s549_s0, 128 }
  0x15   :  { %p352_p8 = scmp.ne.s32.totalorder %s549_s0, %s351_s19  ;;  %p355_p9 = scmp.lt.u32.totalorder %s351_s19, %s549_s0 }
  0x17   :  { %p357_p10 = pnand %p355_p9, %p352_p8 }
  0x19   :  { %360 = shalt.err (!%p357_p10)
}
  0x1a   :  { %s361_s24 = scalar_lea.vmem %s473_s27, 128  ;;  %p366_p12 = scmp.lt.s32.totalorder %s473_s27, %s473_s27 }
  0x1b   :  { %p362_p11 = scmp.ne.s32.totalorder %s473_s27, %s361_s24  ;;  %p367_p13 = scmp.lt.s32.totalorder %s361_s24, %s361_s24 }
  0x1d   :  { %p368_p0 = por %p367_p13, %p366_p12 }
  0x1f   :  { %p369_p1 = pnand %p368_p0, %p362_p11 }
  0x21   :  { %372 = shalt.err (!%p369_p1)
}
  0x22   :  { %26 = dma.hbm_to_vmem [thread:$0]  %s549_s0, 128, %s473_s27, [#allocation3], %s425_s13, %s425_s13, %s426_s14  }
  0x23   :  { %s427_s26 = smov [#allocation7]   ;;  %s373_s8 = scalar_lea.hbm %s553_s4, 16 }
  0x24   :  { %s49_s28 = sshll.u32 %s427_s26, 4  ;;  %p374_p2 = scmp.ne.s32.totalorder %s553_s4, %s373_s8  ;;  %s50_s28 = int_to_ptr.vmem [resolvable:$true] %s49_s28 }
  0x25   :  { %p377_p3 = scmp.lt.u32.totalorder %s373_s8, %s553_s4 }
  0x27   :  { %p379_p4 = pnand %p377_p3, %p374_p2 }
  0x29   :  { %382 = shalt.err (!%p379_p4)
}
  0x2a   :  { %s383_s15 = scalar_lea.vmem %s50_s28, 16  ;;  %s387_s0 = scalar_lea.vmem %s50_s28, 32 }
  0x2b   :  { %p384_p5 = scmp.ne.s32.totalorder %s50_s28, %s383_s15  ;;  %p388_p6 = scmp.lt.s32.totalorder %s50_s28, %s50_s28 }
  0x2c   :  { %p389_p7 = scmp.lt.s32.totalorder %s387_s0, %s383_s15 }
  0x2e   :  { %p390_p8 = por %p389_p7, %p388_p6 }
  0x30   :  { %p391_p9 = pnand %p390_p8, %p384_p5 }
  0x32   :  { %394 = shalt.err (!%p391_p9)
}
  0x33   :  { %52 = dma.hbm_to_vmem [thread:$0]  %s553_s4, 16, %s50_s28, [#allocation6]  }
  0x34   :  { %417 = dma.done.wait [#allocation3], 128  }
  0x35   :  { %418 = vsyncadd [#allocation3], 4294967168 }
  0x36   :  { %419 = dma.done.wait [#allocation6], 272  }
  0x37   :  { %420 = vsyncadd [#allocation6], 4294967024  ;;  %v428_v0 = vmov 0.0   ;;  %vm429_vm0 = vmmov 0   ;;  %v320_v1 = vld [vmem:[#allocation5] sm:$0xff]   ;;  %v321_v2 = vld [vmem:[#allocation5 + $0x8] sm:$0xff]  }
  0x38   :  { %294 = vmatprep.subr.bf16.mxu0 %v428_v0  ;;  %298 = vmatprep.mubr.msk.bf16.mxu0 %vm429_vm0, %v428_v0  ;;  %v322_v3 = vld [vmem:[#allocation2] sm:$0xff]   ;;  %vm97_vm1 = vcmask 261120   ;;  %v277_v4 = vld [vmem:[%s551_s2] ss:$0 sm:$0xff]  ;;  %v324_v26 = vld [vmem:[%s554_s5 + $0x8] sm:$0xff]   ;;  %s430_s22 = smov [#allocation8]  }
  0x39   :  { %302 = vmatprep.subr.bf16.mxu1 %v428_v0  ;;  %306 = vmatprep.mubr.msk.bf16.mxu1 %vm429_vm0, %v428_v0  ;;  %v323_v25 = vld [vmem:[%s554_s5] sm:$0xff]   ;;  %v283_v39 = vld [vmem:[#allocation7] ss:$0 sm:$0xff]  ;;  %s264_s23 = sshll.u32 %s430_s22, 4  ;;  %s265_s23 = int_to_ptr.vmem [resolvable:$true] %s264_s23 }
  0x3a   :  { %295 = vmatpush3.bf16.msra.mxu0 %v320_v1  ;;  %303 = vmatpush3.bf16.msra.mxu1 %v323_v25  ;;  %v282_v33 = vld [vmem:[%s552_s3] ss:$0 sm:$0xff]  ;;  %s395_s3 = scalar_lea.vmem %s265_s23, 256  ;;  %p400_p11 = scmp.lt.s32.totalorder %s265_s23, %s265_s23 }
  0x3b   :  { %296 = vmatprep.subr.bf16.mxu0 %v428_v0  ;;  %304 = vmatprep.subr.bf16.mxu1 %v428_v0  ;;  %v284_v44 = vld [vmem:[%s555_s6] ss:$0 sm:$0xff]  ;;  %p396_p10 = scmp.ne.s32.totalorder %s265_s23, %s395_s3  ;;  %p401_p12 = scmp.lt.s32.totalorder %s395_s3, %s395_s3 }
  0x3d   :  { %p402_p13 = por %p401_p12, %p400_p11 }
  0x3e   :  { %297 = vmatpush3.bf16.msra.mxu0 %v321_v2  ;;  %305 = vmatpush3.bf16.msra.mxu1 %v324_v26 }
  0x3f   :  { %p403_p0 = pnand %p402_p13, %p396_p10 }
  0x41   :  { %299 = vmatmul.mubr.msk.bf16.vlgmr.msra.gmra.mrb[0].mxu0 %vm97_vm1, %v322_v3 }
 0x114   :  { %v135_v5 = vpop.f32.mrb[0].mxu0 }
 0x115   :  { %v136_v6 = vadd.f32 %v277_v4, %v135_v5  ;;  %v300_v7 = vpop.f32.mrb[1].mxu0 }
 0x116   :  { %v138_v8 = vpop.f32.mrb[2].mxu0 }
 0x117   :  { %v142_v9 = vmax.f32 %v136_v6, 0.0  ;;  %v139_v10 = vadd.f32 %v277_v4, %v138_v8  ;;  %v301_v11 = vpop.f32.mrb[3].mxu0 }
 0x119   :  { %v143_v12 = vmax.f32 %v139_v10, 0.0  ;;  %v144_v13 = vsel %vm97_vm1, %v142_v9, 0.0 }
 0x11a   :  { %145 = vadd.xlane.f32.xlu0 %v144_v13 }
 0x11b   :  { %v147_v14 = vsel %vm97_vm1, %v143_v12, 0.0 }
 0x11e   :  { %148 = vadd.xlane.f32.xlu0 %v147_v14 }
 0x1a7   :  { %v146_v15 = vpop.xlane.xlu0 %145 }
 0x1a8   :  { %v151_v16 = vmul.f32 0.03125, %v146_v15 }
 0x1aa   :  { %v153_v17 = vsub.f32 %v142_v9, %v151_v16 }
 0x1ab   :  { %v149_v18 = vpop.xlane.xlu0 %148 }
 0x1ac   :  { %v152_v19 = vmul.f32 0.03125, %v149_v18  ;;  %v155_v20 = vmul.f32 %v153_v17, %v153_v17 }
 0x1ae   :  { %v154_v21 = vsub.f32 %v143_v12, %v152_v19  ;;  %v157_v22 = vsel %vm97_vm1, %v155_v20, 0.0 }
 0x1af   :  { %158 = vadd.xlane.f32.xlu1 %v157_v22 }
 0x1b0   :  { %v156_v23 = vmul.f32 %v154_v21, %v154_v21 }
 0x1b2   :  { %v160_v24 = vsel %vm97_vm1, %v156_v23, 0.0 }
 0x1b3   :  { %161 = vadd.xlane.f32.xlu1 %v160_v24 }
 0x23c   :  { %v159_v27 = vpop.xlane.xlu1 %158 }
 0x23d   :  { %v163_v28 = vmul.f32 0.03125, %v159_v27 }
 0x23f   :  { %v166_v29 = vadd.f32 1e-12, %v163_v28 }
 0x240   :  { %v162_v30 = vpop.xlane.xlu1 %161 }
 0x241   :  { %325 = vrsqrt.f32 %v166_v29  ;;  %v164_v31 = vmul.f32 0.03125, %v162_v30 }
 0x243   :  { %v167_v32 = vadd.f32 1e-12, %v164_v31 }
 0x245   :  { %327 = vrsqrt.f32 %v167_v32 }
 0x24b   :  { %v326_v34 = vpop.eup %325 }
 0x24c   :  { %v176_v35 = vmul.f32 %v326_v34, %v282_v33 }
 0x24e   :  { %v178_v38 = vmul.f32 %v176_v35, %v153_v17 }
 0x24f   :  { %v328_v36 = vpop.eup %327 }
 0x250   :  { %v177_v37 = vmul.f32 %v328_v36, %v282_v33  ;;  %v187_v41 = vadd.f32 %v283_v39, %v178_v38 }
 0x252   :  { %v179_v40 = vmul.f32 %v177_v37, %v154_v21 }
 0x254   :  { %v188_v42 = vadd.f32 %v283_v39, %v179_v40 }
 0x256   :  { %v189_v43 = vpack.c.bf16 %v188_v42, %v187_v41 }
 0x258   :  { %307 = vmatmul.mubr.msk.bf16.vlgmr.msra.gmra.mrb[0].mxu1 %vm97_vm1, %v189_v43 }
 0x32b   :  { %v250_v45 = vpop.f32.mrb[0].mxu1 }
 0x32c   :  { %v251_v46 = vadd.f32 %v284_v44, %v250_v45  ;;  %v308_v47 = vpop.f32.mrb[1].mxu1 }
 0x32d   :  { %v253_v48 = vpop.f32.mrb[2].mxu1 }
 0x32e   :  { %257 = vst [vmem:[#allocation8] sm:$0xff] %v251_v46  ;;  %v254_v49 = vadd.f32 %v284_v44, %v253_v48  ;;  %v309_v50 = vpop.f32.mrb[3].mxu1 }
 0x330   :  { %258 = vst [vmem:[#allocation8 + $0x8] sm:$0xff] %v254_v49 }
 0x331   :  { %406 = shalt.err (!%p403_p0)
}
 0x332   :  { %s407_s1 = scalar_lea.hbm %s556_s7, 256 }
 0x333   :  { %p408_p1 = scmp.ne.s32.totalorder %s556_s7, %s407_s1  ;;  %p411_p2 = scmp.lt.u32.totalorder %s407_s1, %s556_s7 }
 0x335   :  { %p413_p3 = pnand %p411_p2, %p408_p1 }
 0x337   :  { %416 = shalt.err (!%p413_p3)
}
 0x338   :  { %s431_s30 = smov 128   ;;  %s432_s8 = smov 8  }
 0x339   :  { %270 = dma.vmem_to_hbm [thread:$0]  %s265_s23, 256, %s556_s7, [#allocation4], %s431_s30, %s431_s30, %s432_s8  }
 0x33a   :  { %421 = dma.done.wait [#allocation4], 256  }
 0x33b   :  { %422 = vsyncadd [#allocation4], 4294967040 }
 0x33c   :  { %274 = vsyncpa [#allocation3], 1 }
 0x33d   :  { %275 = vsyncpa [#allocation6], 1 }
 0x33e   :  { %276 = vsyncpa [#allocation4], 1 }

</bundles_post_ra>
